<compile_context>
chip_gen: v6e
topology: v6e:2x2x1
jax: 0.10.0
libtpu: 0.0.40
codegen_flags: <defaults>
</compile_context>

<pallas_src>
import jax
import jax.numpy as jnp
from jax.experimental import pallas as pl
from jax.experimental.pallas import tpu as pltpu


def blur_kernel(x_ref, out_ref, xpad_ref):
    # x_ref:    (blkN, H, W)        input block, N = B*C (pure batch: depthwise)
    # out_ref:  (blkN, H-1, W-1)    output block
    # xpad_ref: (blkN, H+2, W+2)    f32 scratch holding the zero-padded block
    _, H, W = x_ref.shape
    _, Hout, Wout = out_ref.shape

    # Build the 1-pixel zero halo in VMEM (cheap, no extra HBM pass).  The
    # scratch is re-zeroed every grid step so correctness never depends on
    # which TensorCore ran step 0 when the N axis is sharded across cores.
    xpad_ref[...] = jnp.zeros_like(xpad_ref)
    xpad_ref[:, 1:1 + H, 1:1 + W] = x_ref[...].astype(jnp.float32)
    x = xpad_ref[...]

    # Separable blur on the VPU, taps (1, 3, 3, 1) per axis; normalization is
    # folded into a single *(1/64) at the end.
    # Horizontal (lane-dim) pass.
    # TODO(synk): on v7x, offload this lane pass to the otherwise-idle MXU
    # (static banded (W+2, Wout) tap matrix) if XLU lane-shift pressure ever
    # binds at the 3.2 TB/s HBM roofline.
    t = (x[:, :, 0:Wout] + x[:, :, 3:3 + Wout]
         + 3.0 * (x[:, :, 1:1 + Wout] + x[:, :, 2:2 + Wout]))
    # Vertical (sublane-dim) pass + combined 1/64 normalization.
    y = (t[:, 0:Hout, :] + t[:, 3:3 + Hout, :]
         + 3.0 * (t[:, 1:1 + Hout, :] + t[:, 2:2 + Hout, :])) * (1.0 / 64.0)

    out_ref[...] = y.astype(out_ref.dtype)


def blur_forward(x_nchw, *, vmem_block_budget_bytes=8 * 1024 * 1024):
    """x_nchw: (B, C, H, W) -> (B, C, H-1, W-1), matching PyTorch `Blur`."""
    B, C, H, W = x_nchw.shape
    K = 4
    pad = (K - 1) // 2                   # int((4 - 1) / 2) = 1
    Hout = H + 2 * pad - K + 1           # = H - 1
    Wout = W + 2 * pad - K + 1           # = W - 1
    N = B * C

    # Depthwise blur treats (B, C) as a pure batch dim: flatten to (N, H, W).
    # NCHW is already contiguous this way -- reshape only, no transpose.
    x = x_nchw.reshape(N, H, W)

    # Tile over N so each pipeline step's working set (double-buffered input
    # and output blocks plus the f32 halo scratch) stays well under the v7x
    # 64 MiB physical VMEM and the smaller scoped defaults elsewhere.
    itemsize = jnp.dtype(x_nchw.dtype).itemsize
    per_n_bytes = (2 * H * W * itemsize            # double-buffered input
                   + 2 * Hout * Wout * itemsize    # double-buffered output
                   + (H + 2) * (W + 2) * 4)        # f32 halo scratch
    target = max(1, vmem_block_budget_bytes // per_n_bytes)
    blkN = 1
    for d in range(1, N + 1):            # largest divisor of N within budget
        if N % d == 0 and d <= target:
            blkN = d
    # TODO(synk): for very large H (planes where even blkN=1 blows the budget)
    # also tile H with a 3-row halo (pl.Element offsets) and strip-fuse the
    # horizontal/vertical passes so `t` only materializes a few rows at a time.

    out = pl.pallas_call(
        blur_kernel,
        out_shape=jax.ShapeDtypeStruct((N, Hout, Wout), x_nchw.dtype),
        grid_spec=pltpu.PrefetchScalarGridSpec(
            num_scalar_prefetch=0,
            grid=(N // blkN,),
            in_specs=[pl.BlockSpec((blkN, H, W), lambda n: (n, 0, 0))],
            out_specs=pl.BlockSpec((blkN, Hout, Wout), lambda n: (n, 0, 0)),
            scratch_shapes=[pltpu.VMEM((blkN, H + 2, W + 2), jnp.float32)],
        ),
        compiler_params=pltpu.CompilerParams(
            dimension_semantics=("parallel",),   # v7x dual-TC shards the N axis
            vmem_limit_bytes=32 * 1024 * 1024,
        ),
    )(x)
    return out.reshape(B, C, Hout, Wout)


def ref_forward(x):
    """Pure-JAX reference matching F.conv2d(..., padding=1, groups=C)."""
    B, C, H, W = x.shape
    k1 = jnp.array([1.0, 3.0, 3.0, 1.0], jnp.float32)
    k2 = jnp.outer(k1, k1)
    k2 = k2 / jnp.sum(k2)
    w = jnp.broadcast_to(k2[None, None], (C, 1, 4, 4)).astype(x.dtype)
    return jax.lax.conv_general_dilated(
        x, w, window_strides=(1, 1),
        padding=[(1, 1), (1, 1)],
        dimension_numbers=("NCHW", "OIHW", "NCHW"),
        feature_group_count=C)


if __name__ == "__main__":
    B, C, H, W = 2, 4, 16, 16
    x = jax.random.normal(jax.random.PRNGKey(0), (B, C, H, W), jnp.float32)

    out = jax.block_until_ready(blur_forward(x))
    ref = ref_forward(x)

    assert out.shape == (B, C, H - 1, W - 1), out.shape
    assert jnp.allclose(out, ref, atol=1e-5, rtol=1e-5), \
        float(jnp.max(jnp.abs(out - ref)))

    print("KERNEL_OK")
</pallas_src>

<mosaic_0001>
module attributes {stable_mosaic.version = 11 : i64} {
  func.func @blur_kernel(%arg0: i32, %arg1: memref<8x16x16xf32, #tpu.memory_space<vmem>>, %arg2: memref<8x15x15xf32, #tpu.memory_space<vmem>>, %arg3: memref<8x18x18xf32, #tpu.memory_space<vmem>>) attributes {dimension_semantics = [#tpu.dimension_semantics<parallel>], iteration_bounds = array<i64: 1>, scalar_prefetch = 0 : i64, scratch_operands = 1 : i64, tpu.core_type = #tpu.core_type<tc>, window_params = [{transform_indices = @transform_0, window_bounds = array<i64: 8, 16, 16>}, {transform_indices = @transform_1, window_bounds = array<i64: 8, 15, 15>}]} {
    %cst = arith.constant 0.000000e+00 : f32
    %0 = vector.broadcast %cst : f32 to vector<8x18x18xf32>
    %c0 = arith.constant 0 : index
    %c0_0 = arith.constant 0 : index
    %c0_1 = arith.constant 0 : index
    %1 = vector.load %arg3[%c0, %c0_0, %c0_1] : memref<8x18x18xf32, #tpu.memory_space<vmem>>, vector<8x18x18xf32>
    tpu.vector_store %arg3[%c0, %c0_0, %c0_1], %0 {strides = array<i32>} : memref<8x18x18xf32, #tpu.memory_space<vmem>>, vector<8x18x18xf32>,
    %c0_2 = arith.constant 0 : index
    %c0_3 = arith.constant 0 : index
    %c0_4 = arith.constant 0 : index
    %2 = vector.load %arg1[%c0_2, %c0_3, %c0_4] : memref<8x16x16xf32, #tpu.memory_space<vmem>>, vector<8x16x16xf32>
    %c0_5 = arith.constant 0 : index
    %c1 = arith.constant 1 : index
    %c1_6 = arith.constant 1 : index
    %3 = vector.load %arg3[%c0_5, %c1, %c1_6] : memref<8x18x18xf32, #tpu.memory_space<vmem>>, vector<8x16x16xf32>
    tpu.vector_store %arg3[%c0_5, %c1, %c1_6], %2 {strides = array<i32>} : memref<8x18x18xf32, #tpu.memory_space<vmem>>, vector<8x16x16xf32>,
    %c0_7 = arith.constant 0 : index
    %c0_8 = arith.constant 0 : index
    %c0_9 = arith.constant 0 : index
    %4 = vector.load %arg3[%c0_7, %c0_8, %c0_9] : memref<8x18x18xf32, #tpu.memory_space<vmem>>, vector<8x18x18xf32>
    %5 = vector.extract_strided_slice %4 {offsets = [0, 0, 0], sizes = [8, 18, 15], strides = [1, 1, 1]} : vector<8x18x18xf32> to vector<8x18x15xf32>
    %6 = vector.extract_strided_slice %4 {offsets = [0, 0, 3], sizes = [8, 18, 15], strides = [1, 1, 1]} : vector<8x18x18xf32> to vector<8x18x15xf32>
    %7 = arith.addf %5, %6 : vector<8x18x15xf32>
    %8 = vector.extract_strided_slice %4 {offsets = [0, 0, 1], sizes = [8, 18, 15], strides = [1, 1, 1]} : vector<8x18x18xf32> to vector<8x18x15xf32>
    %9 = vector.extract_strided_slice %4 {offsets = [0, 0, 2], sizes = [8, 18, 15], strides = [1, 1, 1]} : vector<8x18x18xf32> to vector<8x18x15xf32>
    %10 = arith.addf %8, %9 : vector<8x18x15xf32>
    %cst_10 = arith.constant 3.000000e+00 : f32
    %11 = vector.broadcast %cst_10 : f32 to vector<8x18x15xf32>
    %12 = arith.mulf %11, %10 : vector<8x18x15xf32>
    %13 = arith.addf %7, %12 : vector<8x18x15xf32>
    %14 = vector.extract_strided_slice %13 {offsets = [0, 0, 0], sizes = [8, 15, 15], strides = [1, 1, 1]} : vector<8x18x15xf32> to vector<8x15x15xf32>
    %15 = vector.extract_strided_slice %13 {offsets = [0, 3, 0], sizes = [8, 15, 15], strides = [1, 1, 1]} : vector<8x18x15xf32> to vector<8x15x15xf32>
    %16 = arith.addf %14, %15 : vector<8x15x15xf32>
    %17 = vector.extract_strided_slice %13 {offsets = [0, 1, 0], sizes = [8, 15, 15], strides = [1, 1, 1]} : vector<8x18x15xf32> to vector<8x15x15xf32>
    %18 = vector.extract_strided_slice %13 {offsets = [0, 2, 0], sizes = [8, 15, 15], strides = [1, 1, 1]} : vector<8x18x15xf32> to vector<8x15x15xf32>
    %19 = arith.addf %17, %18 : vector<8x15x15xf32>
    %cst_11 = arith.constant 3.000000e+00 : f32
    %20 = vector.broadcast %cst_11 : f32 to vector<8x15x15xf32>
    %21 = arith.mulf %20, %19 : vector<8x15x15xf32>
    %22 = arith.addf %16, %21 : vector<8x15x15xf32>
    %cst_12 = arith.constant 1.562500e-02 : f32
    %23 = vector.broadcast %cst_12 : f32 to vector<8x15x15xf32>
    %24 = arith.mulf %22, %23 : vector<8x15x15xf32>
    %c0_13 = arith.constant 0 : index
    %c0_14 = arith.constant 0 : index
    %c0_15 = arith.constant 0 : index
    %25 = vector.load %arg2[%c0_13, %c0_14, %c0_15] : memref<8x15x15xf32, #tpu.memory_space<vmem>>, vector<8x15x15xf32>
    tpu.vector_store %arg2[%c0_13, %c0_14, %c0_15], %24 {strides = array<i32>} : memref<8x15x15xf32, #tpu.memory_space<vmem>>, vector<8x15x15xf32>,
    return
  }
  func.func @transform_0(%arg0: i32) -> (i32, i32, i32) {
    %c0_i32 = arith.constant 0 : i32
    %c0_i32_0 = arith.constant 0 : i32
    %c0_i32_1 = arith.constant 0 : i32
    return %arg0, %c0_i32, %c0_i32_0 : i32, i32, i32
  }
  func.func @transform_1(%arg0: i32) -> (i32, i32, i32) {
    %c0_i32 = arith.constant 0 : i32
    %c0_i32_0 = arith.constant 0 : i32
    %c0_i32_1 = arith.constant 0 : i32
    return %arg0, %c0_i32, %c0_i32_0 : i32, i32, i32
  }
}

</mosaic_0001>

<bundles_post_ra>
// kernel: tpu_custom_call.1
= control target key start
LH: loop header
LB: loop body
LE: loop exit
PB: predicated region body
PF: predicated region fallthrough
CT: control target
= control target key end

     0   :  { %6 = vsyncpa [#allocation4], 0  ;;  %s855_s6 = smov [#allocation3]   ;;  %s1326_s0 = inlined_call_operand.hbm [shape: f32[8,16,16], index: 0, kind: input, shape index: {}]   ;;  %s1327_s1 = inlined_call_operand.vmem [shape: f32[8,15,15], index: 1, kind: output, shape index: {}]  }
   0x1   :  { %s12_s7 = sshll.u32 %s855_s6, 4  ;;  %s13_s7 = int_to_ptr.vmem [resolvable:$true] %s12_s7 }
   0x2   :  { %s841_s8 = scalar_lea.vmem %s13_s7, 2048  ;;  %p846_p1 = scmp.lt.s32.totalorder %s13_s7, %s13_s7 }
   0x3   :  { %p842_p0 = scmp.ne.s32.totalorder %s13_s7, %s841_s8  ;;  %p847_p2 = scmp.lt.s32.totalorder %s841_s8, %s841_s8 }
   0x5   :  { %p848_p3 = por %p847_p2, %p846_p1 }
   0x7   :  { %p849_p4 = pnand %p848_p3, %p842_p0 }
   0x9   :  { %852 = shalt.err (!%p849_p4)
}
   0xa   :  { %s856_s9 = smov 128   ;;  %s857_s10 = smov 8  }
   0xb   :  { %18 = dma.hbm_to_vmem [thread:$0]  %s1326_s0, 2048, %s13_s7, [#allocation4], %s856_s9, %s856_s9, %s857_s10  }
   0xc   :  { %853 = dma.done.wait [#allocation4], 2048  }
   0xd   :  { %854 = vsyncadd [#allocation4], 4294965248  ;;  %vm22_vm0 = vcmask 146432   ;;  %v858_v0 = vmov 0.0   ;;  %vm25_vm1 = vcmask 140288   ;;  %v48_v1 = vld [vmem:[#allocation3] sm:$0xff] }
   0xe   :  { %23 = vst.msk [vmem:[#allocation2] sm:$0xff] %vm22_vm0, %v858_v0  ;;  %24 = vst.msk [vmem:[#allocation2 + $0x8] sm:$0xff] %vm22_vm0, %v858_v0  ;;  %v50_v2 = vld [vmem:[#allocation3 + $0x10] sm:$0xff]  ;;  %s859_s0 = smov 1   ;;  %v49_v3 = vld [vmem:[#allocation3 + $0x8] sm:$0xff]  ;;  %vm128_vm2 = vcmask 138248  }
   0xf   :  { %27 = vst.msk [vmem:[#allocation2 + $0x18] sm:$0xff] %vm22_vm0, %v858_v0  ;;  %28 = vst.msk [vmem:[#allocation2 + $0x20] sm:$0xff] %vm22_vm0, %v858_v0  ;;  %80 = vrot.lane.b32.xlu0 %v48_v1, %s859_s0  ;;  %84 = vrot.lane.b32.xlu1 %v50_v2, %s859_s0  ;;  %v51_v4 = vld [vmem:[#allocation3 + $0x18] sm:$0xff]  ;;  %v52_v5 = vld [vmem:[#allocation3 + $0x20] sm:$0xff]  ;;  %s860_s13 = smov 125   ;;  %s861_s14 = smov 127  }
  0x10   :  { %30 = vst.msk [vmem:[#allocation2 + $0x30] sm:$0xff] %vm22_vm0, %v858_v0  ;;  %31 = vst.msk [vmem:[#allocation2 + $0x38] sm:$0xff] %vm22_vm0, %v858_v0  ;;  %v53_v6 = vld [vmem:[#allocation3 + $0x28] sm:$0xff]  ;;  %v55_v7 = vld [vmem:[#allocation3 + $0x38] sm:$0xff]  ;;  %vm553_vm3 = vcmask 1044480   ;;  %vm626_vm4 = vcmask 1046528  }
  0x11   :  { %33 = vst.msk [vmem:[#allocation2 + $0x48] sm:$0xff] %vm22_vm0, %v858_v0  ;;  %34 = vst.msk [vmem:[#allocation2 + $0x50] sm:$0xff] %vm22_vm0, %v858_v0  ;;  %v54_v8 = vld [vmem:[#allocation3 + $0x30] sm:$0xff]  ;;  %v56_v9 = vld [vmem:[#allocation3 + $0x40] sm:$0xff]  ;;  %vm805_vm5 = vcmask 120832   ;;  %vm803_vm6 = vcmask 121856  }
  0x12   :  { %36 = vst.msk [vmem:[#allocation2 + $0x60] sm:$0xff] %vm22_vm0, %v858_v0  ;;  %37 = vst.msk [vmem:[#allocation2 + $0x68] sm:$0xff] %vm22_vm0, %v858_v0  ;;  %v57_v10 = vld [vmem:[#allocation3 + $0x48] sm:$0xff]  ;;  %v59_v11 = vld [vmem:[#allocation3 + $0x58] sm:$0xff] }
  0x13   :  { %39 = vst.msk [vmem:[#allocation2 + $0x78] sm:$0xff] %vm22_vm0, %v858_v0  ;;  %40 = vst.msk [vmem:[#allocation2 + $0x80] sm:$0xff] %vm22_vm0, %v858_v0  ;;  %82 = vrot.lane.b32.xlu0 %v49_v3, %s859_s0  ;;  %86 = vrot.lane.b32.xlu1 %v51_v4, %s859_s0  ;;  %v58_v12 = vld [vmem:[#allocation3 + $0x50] sm:$0xff]  ;;  %v60_v13 = vld [vmem:[#allocation3 + $0x60] sm:$0xff] }
  0x14   :  { %42 = vst.msk [vmem:[#allocation2 + $0x90] sm:$0xff] %vm22_vm0, %v858_v0  ;;  %43 = vst.msk [vmem:[#allocation2 + $0x98] sm:$0xff] %vm22_vm0, %v858_v0  ;;  %v61_v14 = vld [vmem:[#allocation3 + $0x68] sm:$0xff]  ;;  %v63_v15 = vld [vmem:[#allocation3 + $0x78] sm:$0xff] }
  0x15   :  { %45 = vst.msk [vmem:[#allocation2 + $0xa8] sm:$0xff] %vm22_vm0, %v858_v0  ;;  %46 = vst.msk [vmem:[#allocation2 + $0xb0] sm:$0xff] %vm22_vm0, %v858_v0  ;;  %v62_v16 = vld [vmem:[#allocation3 + $0x70] sm:$0xff] }
  0x16   :  { %26 = vst.msk [vmem:[#allocation2 + $0x10] sm:$0x3] %vm25_vm1, %v858_v0  ;;  %29 = vst.msk [vmem:[#allocation2 + $0x28] sm:$0x3] %vm25_vm1, %v858_v0 }
  0x17   :  { %32 = vst.msk [vmem:[#allocation2 + $0x40] sm:$0x3] %vm25_vm1, %v858_v0  ;;  %35 = vst.msk [vmem:[#allocation2 + $0x58] sm:$0x3] %vm25_vm1, %v858_v0  ;;  %88 = vrot.lane.b32.xlu0 %v52_v5, %s859_s0  ;;  %90 = vrot.lane.b32.xlu1 %v53_v6, %s859_s0 }
  0x18   :  { %38 = vst.msk [vmem:[#allocation2 + $0x70] sm:$0x3] %vm25_vm1, %v858_v0  ;;  %41 = vst.msk [vmem:[#allocation2 + $0x88] sm:$0x3] %vm25_vm1, %v858_v0 }
  0x19   :  { %44 = vst.msk [vmem:[#allocation2 + $0xa0] sm:$0x3] %vm25_vm1, %v858_v0  ;;  %47 = vst.msk [vmem:[#allocation2 + $0xb8] sm:$0x3] %vm25_vm1, %v858_v0 }
  0x1b   :  { %94 = vrot.lane.b32.xlu1 %v55_v7, %s859_s0  ;;  %92 = vrot.lane.b32.xlu0 %v54_v8, %s859_s0 }
  0x1f   :  { %96 = vrot.lane.b32.xlu0 %v56_v9, %s859_s0  ;;  %98 = vrot.lane.b32.xlu1 %v57_v10, %s859_s0 }
  0x23   :  { %102 = vrot.lane.b32.xlu1 %v59_v11, %s859_s0  ;;  %100 = vrot.lane.b32.xlu0 %v58_v12, %s859_s0 }
  0x27   :  { %104 = vrot.lane.b32.xlu0 %v60_v13, %s859_s0  ;;  %106 = vrot.lane.b32.xlu1 %v61_v14, %s859_s0 }
  0x2b   :  { %110 = vrot.lane.b32.xlu1 %v63_v15, %s859_s0  ;;  %108 = vrot.lane.b32.xlu0 %v62_v16, %s859_s0 }
  0x81   :  { %v81_v17 = vpop.permute.xlu0 %80  ;;  %v85_v18 = vpop.permute.xlu1 %84 }
  0x82   :  { %129 = vst.msk [vmem:[#allocation2 + $0x1] sm:$0xff] %vm128_vm2, %v81_v17  ;;  %131 = vst.msk [vmem:[#allocation2 + $0x19] sm:$0xff] %vm128_vm2, %v85_v18 }
  0x85   :  { %v83_v19 = vpop.permute.xlu0 %82  ;;  %v87_v20 = vpop.permute.xlu1 %86 }
  0x86   :  { %130 = vst.msk [vmem:[#allocation2 + $0x9] sm:$0xff] %vm128_vm2, %v83_v19  ;;  %132 = vst.msk [vmem:[#allocation2 + $0x21] sm:$0xff] %vm128_vm2, %v87_v20 }
  0x89   :  { %v895_v21 = vld [vmem:[#allocation2] sm:$0xff]  ;;  %v89_v22 = vpop.permute.xlu0 %88  ;;  %v91_v23 = vpop.permute.xlu1 %90  ;;  %v911_v28 = vld [vmem:[#allocation2 + $0x18] sm:$0xff] }
  0x8a   :  { %193 = vrot.lane.b32.xlu0 %v895_v21, %s860_s13  ;;  %133 = vst.msk [vmem:[#allocation2 + $0x31] sm:$0xff] %vm128_vm2, %v89_v22  ;;  %134 = vst.msk [vmem:[#allocation2 + $0x39] sm:$0xff] %vm128_vm2, %v91_v23 }
  0x8d   :  { %v901_v24 = vld [vmem:[#allocation2 + $0x8] sm:$0xff]  ;;  %v903_v25 = vld [vmem:[#allocation2 + $0x10] sm:$0x3]  ;;  %v95_v26 = vpop.permute.xlu1 %94  ;;  %v93_v27 = vpop.permute.xlu0 %92  ;;  %v925_v33 = vld [vmem:[#allocation2 + $0x20] sm:$0xff] }
  0x8e   :  { %195 = vrot.lane.b32.xlu1 %v901_v24, %s860_s13  ;;  %197 = vrot.lane.b32.xlu0 %v903_v25, %s860_s13  ;;  %136 = vst.msk [vmem:[#allocation2 + $0x51] sm:$0xff] %vm128_vm2, %v95_v26  ;;  %135 = vst.msk [vmem:[#allocation2 + $0x49] sm:$0xff] %vm128_vm2, %v93_v27  ;;  %v933_v36 = vld [vmem:[#allocation2 + $0x28] sm:$0x3] }
  0x91   :  { %v97_v29 = vpop.permute.xlu0 %96  ;;  %v99_v30 = vpop.permute.xlu1 %98  ;;  %v935_v37 = vld [vmem:[#allocation2 + $0x30] sm:$0xff]  ;;  %v943_v40 = vld [vmem:[#allocation2 + $0x38] sm:$0xff]  ;;  %v945_v41 = vld [vmem:[#allocation2 + $0x40] sm:$0x3] }
  0x92   :  { %199 = vrot.lane.b32.xlu1 %v911_v28, %s860_s13  ;;  %289 = vrot.lane.b32.xlu0 %v895_v21, %s861_s14  ;;  %137 = vst.msk [vmem:[#allocation2 + $0x61] sm:$0xff] %vm128_vm2, %v97_v29  ;;  %138 = vst.msk [vmem:[#allocation2 + $0x69] sm:$0xff] %vm128_vm2, %v99_v30 }
  0x95   :  { %v103_v31 = vpop.permute.xlu1 %102  ;;  %v101_v32 = vpop.permute.xlu0 %100  ;;  %v951_v42 = vld [vmem:[#allocation2 + $0x48] sm:$0xff]  ;;  %v953_v43 = vld [vmem:[#allocation2 + $0x50] sm:$0xff]  ;;  %v959_v44 = vld [vmem:[#allocation2 + $0x58] sm:$0x3] }
  0x96   :  { %291 = vrot.lane.b32.xlu1 %v901_v24, %s861_s14  ;;  %293 = vrot.lane.b32.xlu0 %v903_v25, %s861_s14  ;;  %140 = vst.msk [vmem:[#allocation2 + $0x81] sm:$0xff] %vm128_vm2, %v103_v31  ;;  %139 = vst.msk [vmem:[#allocation2 + $0x79] sm:$0xff] %vm128_vm2, %v101_v32 }
  0x99   :  { %v105_v34 = vpop.permute.xlu0 %104  ;;  %v107_v35 = vpop.permute.xlu1 %106  ;;  %v961_v45 = vld [vmem:[#allocation2 + $0x60] sm:$0xff]  ;;  %v967_v46 = vld [vmem:[#allocation2 + $0x68] sm:$0xff]  ;;  %v969_v47 = vld [vmem:[#allocation2 + $0x70] sm:$0x3] }
  0x9a   :  { %295 = vrot.lane.b32.xlu1 %v911_v28, %s861_s14  ;;  %297 = vrot.lane.b32.xlu0 %v925_v33, %s861_s14  ;;  %141 = vst.msk [vmem:[#allocation2 + $0x91] sm:$0xff] %vm128_vm2, %v105_v34  ;;  %142 = vst.msk [vmem:[#allocation2 + $0x99] sm:$0xff] %vm128_vm2, %v107_v35 }
  0x9d   :  { %v111_v38 = vpop.permute.xlu1 %110  ;;  %v109_v39 = vpop.permute.xlu0 %108  ;;  %v975_v48 = vld [vmem:[#allocation2 + $0x78] sm:$0xff]  ;;  %v977_v49 = vld [vmem:[#allocation2 + $0x80] sm:$0xff]  ;;  %v983_v50 = vld [vmem:[#allocation2 + $0x88] sm:$0x3] }
  0x9e   :  { %299 = vrot.lane.b32.xlu1 %v933_v36, %s861_s14  ;;  %301 = vrot.lane.b32.xlu0 %v935_v37, %s861_s14  ;;  %144 = vst.msk [vmem:[#allocation2 + $0xb1] sm:$0xff] %vm128_vm2, %v111_v38  ;;  %143 = vst.msk [vmem:[#allocation2 + $0xa9] sm:$0xff] %vm128_vm2, %v109_v39 }
  0xa1   :  { %v985_v51 = vld [vmem:[#allocation2 + $0x90] sm:$0xff]  ;;  %v991_v52 = vld [vmem:[#allocation2 + $0x98] sm:$0xff]  ;;  %v993_v53 = vld [vmem:[#allocation2 + $0xa0] sm:$0x3] }
  0xa2   :  { %303 = vrot.lane.b32.xlu1 %v943_v40, %s861_s14  ;;  %305 = vrot.lane.b32.xlu0 %v945_v41, %s861_s14 }
  0xa5   :  { %v999_v54 = vld [vmem:[#allocation2 + $0xa8] sm:$0xff]  ;;  %v1001_v55 = vld [vmem:[#allocation2 + $0xb0] sm:$0xff]  ;;  %v1007_v56 = vld [vmem:[#allocation2 + $0xb8] sm:$0x3] }
  0xa6   :  { %307 = vrot.lane.b32.xlu1 %v951_v42, %s861_s14  ;;  %309 = vrot.lane.b32.xlu0 %v953_v43, %s861_s14 }
  0xaa   :  { %311 = vrot.lane.b32.xlu1 %v959_v44, %s861_s14  ;;  %313 = vrot.lane.b32.xlu0 %v961_v45, %s861_s14 }
  0xae   :  { %315 = vrot.lane.b32.xlu1 %v967_v46, %s861_s14  ;;  %317 = vrot.lane.b32.xlu0 %v969_v47, %s861_s14 }
  0xb2   :  { %319 = vrot.lane.b32.xlu1 %v975_v48, %s861_s14  ;;  %321 = vrot.lane.b32.xlu0 %v977_v49, %s861_s14 }
  0xb6   :  { %323 = vrot.lane.b32.xlu1 %v983_v50, %s861_s14  ;;  %325 = vrot.lane.b32.xlu0 %v985_v51, %s861_s14 }
  0xba   :  { %327 = vrot.lane.b32.xlu1 %v991_v52, %s861_s14  ;;  %329 = vrot.lane.b32.xlu0 %v993_v53, %s861_s14 }
  0xbe   :  { %331 = vrot.lane.b32.xlu1 %v999_v54, %s861_s14  ;;  %333 = vrot.lane.b32.xlu0 %v1001_v55, %s861_s14 }
  0xc2   :  { %335 = vrot.lane.b32.xlu1 %v1007_v56, %s861_s14  ;;  %201 = vrot.lane.b32.xlu0 %v925_v33, %s860_s13 }
  0xc6   :  { %203 = vrot.lane.b32.xlu1 %v933_v36, %s860_s13  ;;  %205 = vrot.lane.b32.xlu0 %v935_v37, %s860_s13 }
  0xca   :  { %207 = vrot.lane.b32.xlu1 %v943_v40, %s860_s13  ;;  %209 = vrot.lane.b32.xlu0 %v945_v41, %s860_s13 }
  0xce   :  { %211 = vrot.lane.b32.xlu1 %v951_v42, %s860_s13  ;;  %213 = vrot.lane.b32.xlu0 %v953_v43, %s860_s13 }
  0xd2   :  { %215 = vrot.lane.b32.xlu1 %v959_v44, %s860_s13  ;;  %217 = vrot.lane.b32.xlu0 %v961_v45, %s860_s13 }
  0xd6   :  { %219 = vrot.lane.b32.xlu1 %v967_v46, %s860_s13  ;;  %221 = vrot.lane.b32.xlu0 %v969_v47, %s860_s13 }
  0xda   :  { %223 = vrot.lane.b32.xlu1 %v975_v48, %s860_s13  ;;  %225 = vrot.lane.b32.xlu0 %v977_v49, %s860_s13 }
  0xde   :  { %227 = vrot.lane.b32.xlu1 %v983_v50, %s860_s13  ;;  %229 = vrot.lane.b32.xlu0 %v985_v51, %s860_s13 }
  0xe2   :  { %231 = vrot.lane.b32.xlu1 %v991_v52, %s860_s13  ;;  %233 = vrot.lane.b32.xlu0 %v993_v53, %s860_s13 }
  0xe6   :  { %235 = vrot.lane.b32.xlu1 %v999_v54, %s860_s13  ;;  %237 = vrot.lane.b32.xlu0 %v1001_v55, %s860_s13 }
  0xea   :  { %239 = vrot.lane.b32.xlu1 %v1007_v56, %s860_s13 }
  0xfc   :  { %v1051_v57 = vpop.permute.xlu0 %193 }
 0x100   :  { %v1053_v58 = vpop.permute.xlu1 %195  ;;  %v1055_v59 = vpop.permute.xlu0 %197 }
 0x104   :  { %v1057_v60 = vpop.permute.xlu1 %199  ;;  %v290_v61 = vpop.permute.xlu0 %289 }
 0x105   :  { %v361_v62 = vadd.f32 %v290_v61, %v895_v21 }
 0x107   :  { %v385_v63 = vmul.f32 3.0, %v361_v62 }
 0x108   :  { %v292_v0 = vpop.permute.xlu1 %291  ;;  %v294_v1 = vpop.permute.xlu0 %293 }
 0x109   :  { %v362_v2 = vadd.f32 %v292_v0, %v901_v24  ;;  %v363_v3 = vadd.f32 %v294_v1, %v903_v25  ;;  %433 = vrot.lane.b32.xlu0 %v385_v63, %s861_s14 }
 0x10b   :  { %v386_v4 = vmul.f32 3.0, %v362_v2  ;;  %v387_v5 = vmul.f32 3.0, %v363_v3 }
 0x10c   :  { %v296_v6 = vpop.permute.xlu1 %295  ;;  %v298_v7 = vpop.permute.xlu0 %297 }
 0x10d   :  { %v364_v8 = vadd.f32 %v296_v6, %v911_v28  ;;  %v365_v9 = vadd.f32 %v298_v7, %v925_v33  ;;  %435 = vrot.lane.b32.xlu1 %v386_v4, %s861_s14  ;;  %437 = vrot.lane.b32.xlu0 %v387_v5, %s861_s14 }
 0x10f   :  { %v388_v10 = vmul.f32 3.0, %v364_v8  ;;  %v389_v11 = vmul.f32 3.0, %v365_v9 }
 0x110   :  { %v300_v12 = vpop.permute.xlu1 %299  ;;  %v302_v13 = vpop.permute.xlu0 %301 }
 0x111   :  { %v366_v14 = vadd.f32 %v300_v12, %v933_v36  ;;  %v367_v15 = vadd.f32 %v302_v13, %v935_v37  ;;  %439 = vrot.lane.b32.xlu1 %v388_v10, %s861_s14  ;;  %441 = vrot.lane.b32.xlu0 %v389_v11, %s861_s14 }
 0x113   :  { %v390_v16 = vmul.f32 3.0, %v366_v14  ;;  %v391_v17 = vmul.f32 3.0, %v367_v15 }
 0x114   :  { %v304_v18 = vpop.permute.xlu1 %303  ;;  %v306_v19 = vpop.permute.xlu0 %305 }
 0x115   :  { %v368_v20 = vadd.f32 %v304_v18, %v943_v40  ;;  %v369_v22 = vadd.f32 %v306_v19, %v945_v41  ;;  %443 = vrot.lane.b32.xlu1 %v390_v16, %s861_s14  ;;  %445 = vrot.lane.b32.xlu0 %v391_v17, %s861_s14 }
 0x117   :  { %v392_v23 = vmul.f32 3.0, %v368_v20  ;;  %v393_v26 = vmul.f32 3.0, %v369_v22 }
 0x118   :  { %v308_v27 = vpop.permute.xlu1 %307  ;;  %v310_v29 = vpop.permute.xlu0 %309 }
 0x119   :  { %v370_v30 = vadd.f32 %v308_v27, %v951_v42  ;;  %v371_v31 = vadd.f32 %v310_v29, %v953_v43  ;;  %447 = vrot.lane.b32.xlu1 %v392_v23, %s861_s14  ;;  %449 = vrot.lane.b32.xlu0 %v393_v26, %s861_s14 }
 0x11b   :  { %v394_v32 = vmul.f32 3.0, %v370_v30  ;;  %v395_v34 = vmul.f32 3.0, %v371_v31 }
 0x11c   :  { %v312_v35 = vpop.permute.xlu1 %311  ;;  %v314_v38 = vpop.permute.xlu0 %313 }
 0x11d   :  { %v372_v39 = vadd.f32 %v312_v35, %v959_v44  ;;  %v373_v61 = vadd.f32 %v314_v38, %v961_v45  ;;  %451 = vrot.lane.b32.xlu1 %v394_v32, %s861_s14  ;;  %453 = vrot.lane.b32.xlu0 %v395_v34, %s861_s14 }
 0x11f   :  { %v396_v62 = vmul.f32 3.0, %v372_v39  ;;  %v397_v63 = vmul.f32 3.0, %v373_v61 }
 0x120   :  { %v316_v0 = vpop.permute.xlu1 %315  ;;  %v318_v1 = vpop.permute.xlu0 %317 }
 0x121   :  { %v374_v2 = vadd.f32 %v316_v0, %v967_v46  ;;  %v375_v3 = vadd.f32 %v318_v1, %v969_v47  ;;  %455 = vrot.lane.b32.xlu1 %v396_v62, %s861_s14  ;;  %457 = vrot.lane.b32.xlu0 %v397_v63, %s861_s14 }
 0x123   :  { %v398_v4 = vmul.f32 3.0, %v374_v2  ;;  %v399_v5 = vmul.f32 3.0, %v375_v3 }
 0x124   :  { %v320_v6 = vpop.permute.xlu1 %319  ;;  %v322_v7 = vpop.permute.xlu0 %321 }
 0x125   :  { %v376_v8 = vadd.f32 %v320_v6, %v975_v48  ;;  %v377_v9 = vadd.f32 %v322_v7, %v977_v49  ;;  %459 = vrot.lane.b32.xlu1 %v398_v4, %s861_s14  ;;  %461 = vrot.lane.b32.xlu0 %v399_v5, %s861_s14 }
 0x127   :  { %v400_v10 = vmul.f32 3.0, %v376_v8  ;;  %v401_v11 = vmul.f32 3.0, %v377_v9 }
 0x128   :  { %v324_v12 = vpop.permute.xlu1 %323  ;;  %v326_v13 = vpop.permute.xlu0 %325 }
 0x129   :  { %v378_v14 = vadd.f32 %v324_v12, %v983_v50  ;;  %v379_v15 = vadd.f32 %v326_v13, %v985_v51  ;;  %463 = vrot.lane.b32.xlu1 %v400_v10, %s861_s14  ;;  %465 = vrot.lane.b32.xlu0 %v401_v11, %s861_s14 }
 0x12b   :  { %v402_v16 = vmul.f32 3.0, %v378_v14  ;;  %v403_v17 = vmul.f32 3.0, %v379_v15 }
 0x12c   :  { %v328_v18 = vpop.permute.xlu1 %327  ;;  %v330_v19 = vpop.permute.xlu0 %329 }
 0x12d   :  { %v380_v20 = vadd.f32 %v328_v18, %v991_v52  ;;  %v381_v22 = vadd.f32 %v330_v19, %v993_v53  ;;  %467 = vrot.lane.b32.xlu1 %v402_v16, %s861_s14  ;;  %469 = vrot.lane.b32.xlu0 %v403_v17, %s861_s14  ;;  %v265_v16 = vadd.f32 %v1051_v57, %v895_v21 }
 0x12f   :  { %v404_v23 = vmul.f32 3.0, %v380_v20  ;;  %v405_v26 = vmul.f32 3.0, %v381_v22  ;;  %v266_v20 = vadd.f32 %v1053_v58, %v901_v24  ;;  %v267_v22 = vadd.f32 %v1055_v59, %v903_v25 }
 0x130   :  { %v332_v27 = vpop.permute.xlu1 %331  ;;  %v334_v29 = vpop.permute.xlu0 %333 }
 0x131   :  { %v382_v30 = vadd.f32 %v332_v27, %v999_v54  ;;  %v383_v31 = vadd.f32 %v334_v29, %v1001_v55  ;;  %471 = vrot.lane.b32.xlu1 %v404_v23, %s861_s14  ;;  %473 = vrot.lane.b32.xlu0 %v405_v26, %s861_s14  ;;  %v268_v23 = vadd.f32 %v1057_v60, %v911_v28 }
 0x133   :  { %v406_v32 = vmul.f32 3.0, %v382_v30  ;;  %v407_v34 = vmul.f32 3.0, %v383_v31 }
 0x134   :  { %v336_v35 = vpop.permute.xlu1 %335  ;;  %v202_v61 = vpop.permute.xlu0 %201 }
 0x135   :  { %v384_v38 = vadd.f32 %v336_v35, %v1007_v56  ;;  %475 = vrot.lane.b32.xlu1 %v406_v32, %s861_s14  ;;  %477 = vrot.lane.b32.xlu0 %v407_v34, %s861_s14  ;;  %v269_v29 = vadd.f32 %v202_v61, %v925_v33 }
 0x137   :  { %v408_v39 = vmul.f32 3.0, %v384_v38 }
 0x138   :  { %v204_v62 = vpop.permute.xlu1 %203  ;;  %v206_v63 = vpop.permute.xlu0 %205 }
 0x139   :  { %479 = vrot.lane.b32.xlu1 %v408_v39, %s861_s14  ;;  %v270_v21 = vadd.f32 %v204_v62, %v933_v36  ;;  %v271_v31 = vadd.f32 %v206_v63, %v935_v37 }
 0x13c   :  { %v208_v0 = vpop.permute.xlu1 %207  ;;  %v210_v1 = vpop.permute.xlu0 %209 }
 0x13d   :  { %v272_v24 = vadd.f32 %v208_v0, %v943_v40  ;;  %v273_v60 = vadd.f32 %v210_v1, %v945_v41 }
 0x140   :  { %v212_v2 = vpop.permute.xlu1 %211  ;;  %v214_v3 = vpop.permute.xlu0 %213 }
 0x141   :  { %v1137_v35 = vadd.f32 %v212_v2, %v951_v42  ;;  %v1140_v33 = vadd.f32 %v214_v3, %v953_v43 }
 0x144   :  { %v216_v4 = vpop.permute.xlu1 %215  ;;  %v218_v5 = vpop.permute.xlu0 %217 }
 0x145   :  { %v1143_v36 = vadd.f32 %v216_v4, %v959_v44  ;;  %v1150_v0 = vadd.f32 %v218_v5, %v961_v45 }
 0x148   :  { %v220_v6 = vpop.permute.xlu1 %219  ;;  %v222_v7 = vpop.permute.xlu0 %221 }
 0x149   :  { %v1153_v44 = vadd.f32 %v220_v6, %v967_v46  ;;  %v1156_v3 = vadd.f32 %v222_v7, %v969_v47 }
 0x14c   :  { %v224_v8 = vpop.permute.xlu1 %223  ;;  %v1107_v9 = vpop.permute.xlu0 %225 }
 0x14d   :  { %v1159_v4 = vadd.f32 %v224_v8, %v975_v48 }
 0x150   :  { %v1109_v10 = vpop.permute.xlu1 %227  ;;  %v1111_v11 = vpop.permute.xlu0 %229 }
 0x151   :  { %v1167_v47 = vadd.f32 %v1109_v10, %v983_v50  ;;  %v1171_v48 = vadd.f32 %v1111_v11, %v985_v51 }
 0x154   :  { %v1113_v12 = vpop.permute.xlu1 %231  ;;  %v1115_v13 = vpop.permute.xlu0 %233 }
 0x155   :  { %v1176_v8 = vadd.f32 %v1113_v12, %v991_v52  ;;  %v1181_v50 = vadd.f32 %v1115_v13, %v993_v53 }
 0x158   :  { %v1117_v14 = vpop.permute.xlu1 %235  ;;  %v1119_v15 = vpop.permute.xlu0 %237 }
 0x15c   :  { %v1123_v17 = vpop.permute.xlu1 %239 }
 0x17b   :  { %v434_v18 = vpop.permute.xlu0 %433 }
 0x17c   :  { %v505_v19 = vadd.f32 %v434_v18, %v265_v16 }
 0x17e   :  { %v554_v58 = vrot.slane %v505_v19, 3  ;;  %v627_v32 = vrot.slane %v505_v19, 1 }
 0x17f   :  { %v436_v26 = vpop.permute.xlu1 %435  ;;  %v438_v27 = vpop.permute.xlu0 %437 }
 0x180   :  { %v506_v57 = vadd.f32 %v436_v26, %v266_v20  ;;  %v507_v30 = vadd.f32 %v438_v27, %v267_v22 }
 0x182   :  { %v555_v25 = vrot.slane %v506_v57, 3  ;;  %v628_v59 = vrot.slane %v506_v57, 1  ;;  %v557_v34 = vrot.slane %v507_v30, 3  ;;  %v630_v28 = vrot.slane %v507_v30, 1 }
 0x183   :  { %v440_v37 = vpop.permute.xlu1 %439  ;;  %v442_v38 = vpop.permute.xlu0 %441 }
 0x184   :  { %v556_v40 = vsel %vm553_vm3, %v554_v58, %v555_v25  ;;  %v629_v39 = vsel %vm626_vm4, %v627_v32, %v628_v59  ;;  %v558_v61 = vsel %vm553_vm3, %v555_v25, %v557_v34  ;;  %v631_v41 = vsel %vm626_vm4, %v628_v59, %v630_v28 }
 0x185   :  { %v610_v62 = vadd.f32 %v556_v40, %v505_v19  ;;  %v683_v42 = vadd.f32 %v629_v39, %v505_v19  ;;  %v611_v63 = vadd.f32 %v558_v61, %v506_v57  ;;  %v684_v43 = vadd.f32 %v631_v41, %v506_v57 }
 0x186   :  { %v508_v1 = vadd.f32 %v440_v37, %v268_v23  ;;  %v509_v2 = vadd.f32 %v442_v38, %v269_v29  ;;  %v1163_v23 = vadd.f32 %v1107_v9, %v977_v49 }
 0x187   :  { %v699_v16 = vmul.f32 3.0, %v683_v42  ;;  %v700_v18 = vmul.f32 3.0, %v684_v43  ;;  %v444_v19 = vpop.permute.xlu1 %443  ;;  %v446_v20 = vpop.permute.xlu0 %445 }
 0x188   :  { %v559_v22 = vrot.slane %v508_v1, 3  ;;  %v632_v26 = vrot.slane %v508_v1, 1  ;;  %v560_v27 = vrot.slane %v509_v2, 3  ;;  %v633_v45 = vrot.slane %v509_v2, 1 }
 0x189   :  { %v731_v5 = vrot.slane %v699_v16, 1  ;;  %v732_v57 = vrot.slane %v700_v18, 1  ;;  %v510_v46 = vadd.f32 %v444_v19, %v270_v21  ;;  %v511_v6 = vadd.f32 %v446_v20, %v271_v31 }
 0x18a   :  { %v634_v7 = vsel %vm626_vm4, %v632_v26, %v633_v45  ;;  %v561_v58 = vsel %vm553_vm3, %v559_v22, %v560_v27 }
 0x18b   :  { %v733_v29 = vsel %vm626_vm4, %v731_v5, %v732_v57  ;;  %v772_v21 = vadd.f32 %v732_v57, %v611_v63  ;;  %v685_v30 = vadd.f32 %v634_v7, %v508_v1  ;;  %v448_v49 = vpop.permute.xlu1 %447  ;;  %v450_v9 = vpop.permute.xlu0 %449  ;;  %v562_v31 = vrot.slane %v510_v46, 3 }
 0x18c   :  { %v771_v10 = vadd.f32 %v733_v29, %v610_v62  ;;  %v635_v51 = vrot.slane %v510_v46, 1  ;;  %v564_v32 = vrot.slane %v511_v6, 3  ;;  %v512_v25 = vadd.f32 %v448_v49, %v272_v24 }
 0x18d   :  { %v788_v11 = vmul.f32 0.015625, %v772_v21  ;;  %v701_v12 = vmul.f32 3.0, %v685_v30  ;;  %v513_v34 = vadd.f32 %v450_v9, %v273_v60  ;;  %v563_v53 = vsel %vm553_vm3, %v560_v27, %v562_v31 }
 0x18e   :  { %v787_v52 = vmul.f32 0.015625, %v771_v10  ;;  %v636_v59 = vsel %vm626_vm4, %v633_v45, %v635_v51  ;;  %v637_v28 = vrot.slane %v511_v6, 1  ;;  %v565_v37 = vrot.slane %v512_v25, 3 }
 0x18f   :  { %806 = vst.msk [vmem:[%s1327_s1 + $0x8] sm:$0x7f] %vm805_vm5, %v788_v11  ;;  %v686_v13 = vadd.f32 %v636_v59, %v509_v2  ;;  %v452_v38 = vpop.permute.xlu1 %451  ;;  %v454_v40 = vpop.permute.xlu0 %453  ;;  %v638_v24 = vrot.slane %v512_v25, 1  ;;  %v567_v39 = vrot.slane %v513_v34, 3  ;;  %v640_v60 = vrot.slane %v513_v34, 1 }
 0x190   :  { %804 = vst.msk [vmem:[%s1327_s1] sm:$0xff] %vm803_vm6, %v787_v52  ;;  %v1195_v61 = vadd.f32 %v452_v38, %v1137_v35  ;;  %v612_v41 = vadd.f32 %v561_v58, %v508_v1  ;;  %v566_v42 = vsel %vm553_vm3, %v564_v32, %v565_v37  ;;  %v515_v63 = vadd.f32 %v454_v40, %v1140_v33 }
 0x191   :  { %v702_v62 = vmul.f32 3.0, %v686_v13  ;;  %v734_v43 = vrot.slane %v701_v12, 1  ;;  %v639_v16 = vsel %vm626_vm4, %v637_v28, %v638_v24  ;;  %v568_v18 = vsel %vm553_vm3, %v565_v37, %v567_v39 }
 0x192   :  { %v641_v19 = vsel %vm626_vm4, %v638_v24, %v640_v60  ;;  %v613_v20 = vadd.f32 %v563_v53, %v509_v2  ;;  %v687_v26 = vadd.f32 %v639_v16, %v511_v6  ;;  %v614_v5 = vadd.f32 %v566_v42, %v511_v6 }
 0x193   :  { %v735_v22 = vrot.slane %v702_v62, 1  ;;  %v688_v27 = vadd.f32 %v641_v19, %v512_v25  ;;  %v456_v45 = vpop.permute.xlu1 %455  ;;  %v458_v35 = vpop.permute.xlu0 %457  ;;  %v615_v1 = vadd.f32 %v568_v18, %v512_v25  ;;  %v642_v57 = vrot.slane %v1195_v61, 1 }
 0x194   :  { %v643_v46 = vrot.slane %v515_v63, 1  ;;  %v703_v29 = vmul.f32 3.0, %v687_v26  ;;  %v569_v49 = vrot.slane %v1195_v61, 3  ;;  %v516_v9 = vadd.f32 %v456_v45, %v1143_v36 }
 0x195   :  { %v736_v33 = vsel %vm626_vm4, %v734_v43, %v735_v22  ;;  %v774_v7 = vadd.f32 %v735_v22, %v613_v20  ;;  %v704_v21 = vmul.f32 3.0, %v688_v27  ;;  %v570_v6 = vrot.slane %v515_v63, 3 }
 0x196   :  { %v773_v30 = vadd.f32 %v736_v33, %v612_v41  ;;  %v644_v2 = vsel %vm626_vm4, %v642_v57, %v643_v46  ;;  %v737_v31 = vrot.slane %v703_v29, 1  ;;  %v572_v52 = vrot.slane %v516_v9, 3 }
 0x197   :  { %v790_v10 = vmul.f32 0.015625, %v774_v7  ;;  %v738_v51 = vrot.slane %v704_v21, 1  ;;  %v460_v11 = vpop.permute.xlu1 %459  ;;  %v462_v58 = vpop.permute.xlu0 %461  ;;  %v689_v25 = vadd.f32 %v644_v2, %v1195_v61  ;;  %v645_v12 = vrot.slane %v516_v9, 1 }
 0x198   :  { %v789_v32 = vmul.f32 0.015625, %v773_v30  ;;  %v517_v36 = vadd.f32 %v458_v35, %v1150_v0  ;;  %v518_v53 = vadd.f32 %v460_v11, %v1153_v44  ;;  %v1217_v13 = vadd.f32 %v1117_v14, %v999_v54 }
 0x199   :  { %808 = vst.msk [vmem:[%s1327_s1 + $0x18] sm:$0x7f] %vm805_vm5, %v790_v10  ;;  %v739_v59 = vsel %vm626_vm4, %v737_v31, %v738_v51  ;;  %v776_v34 = vadd.f32 %v738_v51, %v615_v1  ;;  %v705_v37 = vmul.f32 3.0, %v689_v25  ;;  %v646_v38 = vsel %vm626_vm4, %v643_v46, %v645_v12 }
 0x19a   :  { %807 = vst.msk [vmem:[%s1327_s1 + $0x10] sm:$0xff] %vm803_vm6, %v789_v32  ;;  %v775_v28 = vadd.f32 %v739_v59, %v614_v5  ;;  %v1226_v40 = vadd.f32 %v1119_v15, %v1001_v55  ;;  %v573_v44 = vsel %vm553_vm3, %v570_v6, %v572_v52  ;;  %v690_v24 = vadd.f32 %v646_v38, %v515_v63 }
 0x19b   :  { %v792_v0 = vmul.f32 0.015625, %v776_v34  ;;  %v464_v39 = vpop.permute.xlu1 %463  ;;  %v466_v54 = vpop.permute.xlu0 %465  ;;  %v571_v60 = vsel %vm553_vm3, %v569_v49, %v570_v6  ;;  %v647_v41 = vrot.slane %v517_v36, 1  ;;  %v575_v62 = vrot.slane %v518_v53, 3 }
 0x19c   :  { %v791_v14 = vmul.f32 0.015625, %v775_v28  ;;  %v706_v42 = vmul.f32 3.0, %v690_v24  ;;  %v648_v43 = vrot.slane %v518_v53, 1  ;;  %v519_v55 = vadd.f32 %v462_v58, %v1156_v3 }
 0x19d   :  { %810 = vst.msk [vmem:[%s1327_s1 + $0x28] sm:$0x7f] %vm805_vm5, %v792_v0  ;;  %v1236_v15 = vadd.f32 %v464_v39, %v1159_v4  ;;  %v1240_v16 = vadd.f32 %v1123_v17, %v1007_v56  ;;  %v740_v18 = vrot.slane %v705_v37, 1  ;;  %v617_v19 = vadd.f32 %v573_v44, %v515_v63 }
 0x19e   :  { %809 = vst.msk [vmem:[%s1327_s1 + $0x20] sm:$0xff] %vm803_vm6, %v791_v14  ;;  %v574_v20 = vrot.slane %v517_v36, 3  ;;  %v741_v22 = vrot.slane %v706_v42, 1  ;;  %v649_v26 = vsel %vm626_vm4, %v647_v41, %v648_v43  ;;  %v577_v27 = vrot.slane %v519_v55, 3 }
 0x19f   :  { %v521_v3 = vadd.f32 %v466_v54, %v1163_v23  ;;  %v468_v4 = vpop.permute.xlu1 %467  ;;  %v470_v45 = vpop.permute.xlu0 %469  ;;  %v616_v35 = vadd.f32 %v571_v60, %v1195_v61  ;;  %v691_v17 = vadd.f32 %v649_v26, %v517_v36  ;;  %v650_v5 = vrot.slane %v519_v55, 1 }
 0x1a0   :  { %v576_v56 = vsel %vm553_vm3, %v574_v20, %v575_v62  ;;  %v742_v1 = vsel %vm626_vm4, %v740_v18, %v741_v22  ;;  %v778_v57 = vadd.f32 %v741_v22, %v617_v19  ;;  %v579_v63 = vrot.slane %v1236_v15, 3 }
 0x1a1   :  { %v652_v46 = vrot.slane %v1236_v15, 1  ;;  %v777_v33 = vadd.f32 %v742_v1, %v616_v35  ;;  %v707_v7 = vmul.f32 3.0, %v691_v17  ;;  %v578_v29 = vsel %vm553_vm3, %v575_v62, %v577_v27 }
 0x1a2   :  { %v651_v23 = vsel %vm626_vm4, %v648_v43, %v650_v5  ;;  %v794_v21 = vmul.f32 0.015625, %v778_v57  ;;  %v580_v61 = vrot.slane %v521_v3, 3  ;;  %v653_v49 = vrot.slane %v521_v3, 1 }
 0x1a3   :  { %v692_v30 = vadd.f32 %v651_v23, %v518_v53  ;;  %v472_v2 = vpop.permute.xlu1 %471  ;;  %v793_v9 = vmul.f32 0.015625, %v777_v33  ;;  %v618_v10 = vadd.f32 %v576_v56, %v517_v36  ;;  %v743_v31 = vrot.slane %v707_v7, 1  ;;  %v474_v6 = vpop.permute.xlu0 %473 }
 0x1a4   :  { %v522_v51 = vadd.f32 %v468_v4, %v1167_v47  ;;  %812 = vst.msk [vmem:[%s1327_s1 + $0x38] sm:$0x7f] %vm805_vm5, %v794_v21  ;;  %v654_v58 = vsel %vm626_vm4, %v652_v46, %v653_v49  ;;  %v1262_v32 = vadd.f32 %v470_v45, %v1171_v48  ;;  %v524_v25 = vadd.f32 %v472_v2, %v1176_v8 }
 0x1a5   :  { %v708_v11 = vmul.f32 3.0, %v692_v30  ;;  %811 = vst.msk [vmem:[%s1327_s1 + $0x30] sm:$0xff] %vm803_vm6, %v793_v9  ;;  %v619_v47 = vadd.f32 %v578_v29, %v518_v53  ;;  %v693_v52 = vadd.f32 %v654_v58, %v1236_v15  ;;  %v581_v36 = vsel %vm553_vm3, %v579_v63, %v580_v61 }
 0x1a6   :  { %v582_v12 = vrot.slane %v522_v51, 3  ;;  %v655_v59 = vrot.slane %v522_v51, 1  ;;  %v657_v28 = vrot.slane %v1262_v32, 1  ;;  %v525_v48 = vadd.f32 %v474_v6, %v1181_v50 }
 0x1a7   :  { %v744_v34 = vrot.slane %v708_v11, 1  ;;  %v476_v37 = vpop.permute.xlu1 %475  ;;  %v709_v38 = vmul.f32 3.0, %v693_v52  ;;  %v658_v44 = vrot.slane %v524_v25, 1  ;;  %v584_v54 = vrot.slane %v1262_v32, 3  ;;  %v478_v42 = vpop.permute.xlu0 %477 }
 0x1a8   :  { %v583_v8 = vsel %vm553_vm3, %v580_v61, %v582_v12  ;;  %v656_v0 = vsel %vm626_vm4, %v653_v49, %v655_v59  ;;  %v585_v41 = vrot.slane %v524_v25, 3  ;;  %v587_v22 = vrot.slane %v525_v48, 3 }
 0x1a9   :  { %v745_v53 = vsel %vm626_vm4, %v743_v31, %v744_v34  ;;  %v780_v24 = vadd.f32 %v744_v34, %v619_v47  ;;  %v694_v39 = vadd.f32 %v656_v0, %v521_v3  ;;  %v621_v60 = vadd.f32 %v583_v8, %v521_v3 }
 0x1aa   :  { %v779_v14 = vadd.f32 %v745_v53, %v618_v10  ;;  %v659_v62 = vsel %vm626_vm4, %v657_v28, %v658_v44  ;;  %v746_v43 = vrot.slane %v709_v38, 1  ;;  %v660_v26 = vrot.slane %v525_v48, 1 }
 0x1ab   :  { %v796_v50 = vmul.f32 0.015625, %v780_v24  ;;  %v710_v55 = vmul.f32 3.0, %v694_v39  ;;  %v695_v18 = vadd.f32 %v659_v62, %v1262_v32  ;;  %v480_v19 = vpop.permute.xlu1 %479  ;;  %v526_v27 = vadd.f32 %v476_v37, %v1217_v13 }
 0x1ac   :  { %v795_v20 = vmul.f32 0.015625, %v779_v14  ;;  %v527_v45 = vadd.f32 %v478_v42, %v1226_v40  ;;  %v528_v35 = vadd.f32 %v480_v19, %v1240_v16  ;;  %v620_v56 = vadd.f32 %v581_v36, %v1236_v15 }
 0x1ad   :  { %814 = vst.msk [vmem:[%s1327_s1 + $0x48] sm:$0x7f] %vm805_vm5, %v796_v50  ;;  %v747_v3 = vrot.slane %v710_v55, 1  ;;  %v711_v4 = vmul.f32 3.0, %v695_v18  ;;  %v661_v13 = vsel %vm626_vm4, %v658_v44, %v660_v26  ;;  %v662_v17 = vrot.slane %v526_v27, 1 }
 0x1ae   :  { %813 = vst.msk [vmem:[%s1327_s1 + $0x40] sm:$0xff] %vm803_vm6, %v795_v20  ;;  %v586_v57 = vsel %vm553_vm3, %v584_v54, %v585_v41  ;;  %v588_v63 = vsel %vm553_vm3, %v585_v41, %v587_v22  ;;  %v696_v46 = vadd.f32 %v661_v13, %v524_v25  ;;  %v589_v16 = vrot.slane %v526_v27, 3 }
 0x1af   :  { %v748_v5 = vsel %vm626_vm4, %v746_v43, %v747_v3  ;;  %v782_v1 = vadd.f32 %v747_v3, %v621_v60  ;;  %v663_v33 = vrot.slane %v527_v45, 1  ;;  %v749_v29 = vrot.slane %v711_v4, 1 }
 0x1b0   :  { %v781_v40 = vadd.f32 %v748_v5, %v620_v56  ;;  %v592_v23 = vrot.slane %v528_v35, 3  ;;  %v665_v21 = vrot.slane %v528_v35, 1  ;;  %v712_v15 = vmul.f32 3.0, %v696_v46 }
 0x1b1   :  { %v798_v7 = vmul.f32 0.015625, %v782_v1  ;;  %v590_v61 = vrot.slane %v527_v45, 3  ;;  %v664_v49 = vsel %vm626_vm4, %v662_v17, %v663_v33  ;;  %v623_v10 = vadd.f32 %v588_v63, %v524_v25 }
 0x1b2   :  { %v797_v30 = vmul.f32 0.015625, %v781_v40  ;;  %v697_v2 = vadd.f32 %v664_v49, %v526_v27  ;;  %v666_v9 = vsel %vm626_vm4, %v663_v33, %v665_v21  ;;  %v750_v31 = vrot.slane %v712_v15, 1 }
 0x1b3   :  { %816 = vst.msk [vmem:[%s1327_s1 + $0x58] sm:$0x7f] %vm805_vm5, %v798_v7  ;;  %v698_v51 = vadd.f32 %v666_v9, %v527_v45  ;;  %v622_v6 = vadd.f32 %v586_v57, %v1262_v32  ;;  %v593_v58 = vsel %vm553_vm3, %v590_v61, %v592_v23  ;;  %v591_v12 = vsel %vm553_vm3, %v589_v16, %v590_v61 }
 0x1b4   :  { %815 = vst.msk [vmem:[%s1327_s1 + $0x50] sm:$0xff] %vm803_vm6, %v797_v30  ;;  %v713_v11 = vmul.f32 3.0, %v697_v2  ;;  %v751_v47 = vsel %vm626_vm4, %v749_v29, %v750_v31  ;;  %v784_v52 = vadd.f32 %v750_v31, %v623_v10  ;;  %v625_v48 = vadd.f32 %v593_v58, %v527_v45 }
 0x1b5   :  { %v714_v59 = vmul.f32 3.0, %v698_v51  ;;  %v783_v34 = vadd.f32 %v751_v47, %v622_v6  ;;  %v624_v25 = vadd.f32 %v591_v12, %v526_v27 }
 0x1b6   :  { %v800_v36 = vmul.f32 0.015625, %v784_v52  ;;  %v752_v28 = vrot.slane %v713_v11, 1 }
 0x1b7   :  { %v753_v37 = vrot.slane %v714_v59, 1  ;;  %v799_v38 = vmul.f32 0.015625, %v783_v34 }
 0x1b8   :  { %818 = vst.msk [vmem:[%s1327_s1 + $0x68] sm:$0x7f] %vm805_vm5, %v800_v36 }
 0x1b9   :  { %v754_v32 = vsel %vm626_vm4, %v752_v28, %v753_v37  ;;  %v786_v8 = vadd.f32 %v753_v37, %v625_v48  ;;  %817 = vst.msk [vmem:[%s1327_s1 + $0x60] sm:$0xff] %vm803_vm6, %v799_v38 }
 0x1ba   :  { %v785_v0 = vadd.f32 %v754_v32, %v624_v25 }
 0x1bb   :  { %v802_v44 = vmul.f32 0.015625, %v786_v8 }
 0x1bc   :  { %v801_v53 = vmul.f32 0.015625, %v785_v0 }
 0x1bd   :  { %820 = vst.msk [vmem:[%s1327_s1 + $0x78] sm:$0x7f] %vm805_vm5, %v802_v44 }
 0x1be   :  { %819 = vst.msk [vmem:[%s1327_s1 + $0x70] sm:$0xff] %vm803_vm6, %v801_v53 }
 0x1bf   :  { %825 = vsyncpa [#allocation4], 1 }

</bundles_post_ra>
